<compile_context>
chip_gen: v7x
topology: tpu7x:2x2x1
jax: 0.10.0
libtpu: 0.0.40
codegen_flags: <defaults>
</compile_context>

<pallas_src>
from functools import partial

import jax
import jax.numpy as jnp
from jax import lax
from jax.experimental import pallas as pl
from jax.experimental.pallas import tpu as pltpu


def neuro_kernel(x_ref, w1_ref, b1_ref, w2_ref, b2_ref, o_ref, acc_ref, *,
                 compute_dtype):
    k = pl.program_id(1)

    @pl.when(k == 0)
    def _():
        acc_ref[...] = jnp.zeros_like(acc_ref)

    # Cast x at the VMEM->vreg boundary: HBM traffic stays one f32 read per
    # element; only the MXU inputs are narrowed (w1 is already compute_dtype).
    xc = x_ref[...].astype(compute_dtype)

    # Layer 1 on the MXU: (H, tk) x (TB, tk) contracted over the shared
    # input_dim axis -> (H, TB).  Batch lands on the lane axis; this is the
    # natively supported transposed-RHS form, no explicit transpose of x.
    acc_ref[...] += lax.dot_general(
        w1_ref[...], xc,
        dimension_numbers=(((1,), (1,)), ((), ())),
        preferred_element_type=jnp.float32)

    @pl.when(k == pl.num_programs(1) - 1)
    def _():
        hT = jnp.maximum(acc_ref[...] + b1_ref[...], 0.0)        # bias + ReLU (f32 VPU)
        # Layer 2 has out_features == 1: VPU multiply + cross-sublane reduce
        # beats an MXU matmul with a single useful output column.
        out = jnp.sum(hT * w2_ref[...], axis=0, keepdims=True)   # (1, TB), lane-dense
        o_ref[...] = (out + b2_ref[0, 0]).astype(o_ref.dtype)


def _round_up(n, m):
    return (n + m - 1) // m * m


def _cdiv(a, b):
    return -(-a // b)


def _vmem_caps():
    """Generation-aware (tiling_budget_bytes, vmem_limit_bytes)."""
    try:
        cap = int(pltpu.get_tpu_info().vmem_capacity_bytes)
    except Exception:
        cap = 64 * 1024 * 1024                      # unknown: assume v7x-sized
    if cap >= 128 * 1024 * 1024:                    # v5e / v6e
        return 80 * 1024 * 1024, 100 * 1024 * 1024
    return 24 * 1024 * 1024, 32 * 1024 * 1024       # v7x (64 MiB physical)


def _pick_tiles(batch, d_in, hidden, comp_itemsize, budget):
    """Choose (tb, num_b, tk, num_k) with layout-padded VMEM accounting.

    Accounts for (8,128)-padded tiles, double-buffered inputs, the f32
    accumulator scratch and one elementwise temporary.
    """
    d_lane = _round_up(d_in, 128)
    h_sub = _round_up(hidden, 16)                   # covers bf16 sublane packing

    # --- K (input_dim) tiling only when resident w1 would blow the budget.
    w1_resident = 2 * h_sub * d_lane * comp_itemsize          # double-buffered
    if w1_resident <= budget // 3:
        tk, num_k = d_in, 1
    else:
        tk = max(((budget // 3) // (2 * h_sub * comp_itemsize)) // 128 * 128, 128)
        num_k = _cdiv(d_in, tk)
        if num_k == 1:
            tk = d_in                               # never leave OOB K columns
    tk_lane = _round_up(tk, 128)

    small = 4 * h_sub * 128 * 4                      # b1 + w2 blocks (padded, x2)
    avail = max(budget - 2 * h_sub * tk_lane * comp_itemsize - small, 2 << 20)

    # Per batch column: x tile (f32 in VMEM, double-buffered) + f32 accumulator
    # + one elementwise temp + padded output block.
    per_col = 2 * tk_lane * 4 + 3 * h_sub * 4 + 2 * 8 * 4
    tb_cap = max(int(avail // per_col), 8)

    if batch <= 256 and _round_up(batch, 8) <= tb_cap:
        return batch, 1, tk, num_k                   # one lane-dense tile

    # Multi-tile: lane-dense 128-aligned tiles; force >=2 (prefer >=4) grid
    # steps so the batch axis can shard across v7x's two TensorCores.
    tb_cap = max(tb_cap // 128 * 128, 128)
    target_steps = 4 if batch >= 4 * 128 else 2
    tb = max(min(tb_cap, _round_up(_cdiv(batch, target_steps), 128)), 128)
    return tb, _cdiv(batch, tb), tk, num_k


@partial(jax.jit, static_argnames=("compute_dtype",))
def neuro_layer(x, w1, b1, w2, b2, compute_dtype=jnp.float32):
    """Forward pass of NeuroLayer.

    x : (B, input_dim)
    w1: (hidden_dim, input_dim)   (PyTorch nn.Linear weight convention)
    b1: (hidden_dim,)
    w2: (1, hidden_dim)
    b2: (1,)
    returns (B, 1), same dtype as x.

    compute_dtype: dtype fed to the MXU (bf16 recommended on v6e/v7x); the
    cast of x happens inside the kernel, accumulation stays f32 either way.
    """
    B, d_in = x.shape
    hidden = w1.shape[0]
    comp_dt = jnp.dtype(compute_dtype)

    budget, vmem_limit = _vmem_caps()
    tb, num_b, tk, num_k = _pick_tiles(B, d_in, hidden, comp_dt.itemsize, budget)

    # Weights/biases are tiny and VMEM-resident: relayout/cast in the wrapper.
    # x is NOT touched here (no pad, no cast) -> single HBM read in the kernel.
    w1_c = w1.astype(comp_dt)
    b1_col = b1.reshape(hidden, 1).astype(jnp.float32)
    w2_col = w2.reshape(hidden, 1).astype(jnp.float32)
    b2_sc = b2.reshape(1, 1).astype(jnp.float32)

    x_in = x
    if num_k > 1:
        # Rare huge-input_dim path: zero-pad the contraction dim so ragged K
        # blocks never feed garbage into the accumulation.  Costs one extra
        # HBM pass over x, only taken when w1 alone cannot sit in VMEM.
        d_pad = num_k * tk
        x_in = jnp.pad(x, ((0, 0), (0, d_pad - d_in)))
        w1_c = jnp.pad(w1_c, ((0, 0), (0, d_pad - d_in)))

    cost = pl.CostEstimate(
        flops=int(2 * B * d_in * hidden + 3 * B * hidden),
        transcendentals=0,
        bytes_accessed=int(B * d_in * x.dtype.itemsize
                           + hidden * d_in * comp_dt.itemsize
                           + hidden * 8 + B * x.dtype.itemsize))

    out_row = pl.pallas_call(
        partial(neuro_kernel, compute_dtype=comp_dt),
        out_shape=jax.ShapeDtypeStruct((1, B), x.dtype),
        grid=(num_b, num_k),
        in_specs=[
            pl.BlockSpec((tb, tk), lambda i, k: (i, k)),         # x: batch/K tiled
            pl.BlockSpec((hidden, tk), lambda i, k: (0, k)),     # w1
            pl.BlockSpec((hidden, 1), lambda i, k: (0, 0)),      # b1 column
            pl.BlockSpec((hidden, 1), lambda i, k: (0, 0)),      # w2 column
            pl.BlockSpec(memory_space=pltpu.MemorySpace.SMEM),   # b2 scalar
        ],
        out_specs=pl.BlockSpec((1, tb), lambda i, k: (0, i)),    # lane-dense out
        scratch_shapes=[pltpu.VMEM((hidden, tb), jnp.float32)],  # hT accumulator
        compiler_params=pltpu.CompilerParams(
            dimension_semantics=("parallel", "arbitrary"),
            vmem_limit_bytes=vmem_limit,
        ),
        cost_estimate=cost,
    )(x_in, w1_c, b1_col, w2_col, b2_sc)

    return out_row.reshape(B, 1)


def reference(x, w1, b1, w2, b2):
    h = jnp.maximum(x @ w1.T + b1, 0.0)
    return h @ w2.T + b2


if __name__ == "__main__":
    key = jax.random.PRNGKey(0)
    input_dim, hidden_dim = 32, 32
    k_x, k_w1, k_b1, k_w2, k_b2, k_x2 = jax.random.split(key, 6)

    # Deterministic synthetic params (PyTorch-style uniform bounds).
    bound1 = 1.0 / jnp.sqrt(input_dim)
    w1 = jax.random.uniform(k_w1, (hidden_dim, input_dim), jnp.float32,
                            -bound1, bound1)
    b1 = jax.random.uniform(k_b1, (hidden_dim,), jnp.float32, -bound1, bound1)
    bound2 = 1.0 / jnp.sqrt(hidden_dim)
    w2 = jax.random.uniform(k_w2, (1, hidden_dim), jnp.float32, -bound2, bound2)
    b2 = jax.random.uniform(k_b2, (1,), jnp.float32, -bound2, bound2)

    # Small batch: single-tile path, f32 and bf16-MXU variants.
    x = jax.random.normal(k_x, (8, input_dim), dtype=jnp.float32)
    ref = reference(x, w1, b1, w2, b2)

    out = jax.block_until_ready(neuro_layer(x, w1, b1, w2, b2))
    assert out.shape == (8, 1)
    assert jnp.allclose(out, ref, atol=1e-5, rtol=1e-5)

    out_bf16 = jax.block_until_ready(
        neuro_layer(x, w1, b1, w2, b2, compute_dtype=jnp.bfloat16))
    assert out_bf16.shape == (8, 1)
    assert jnp.allclose(out_bf16, ref, atol=3e-2, rtol=3e-2)

    # Larger, non-tile-aligned batch: multi-tile grid with a ragged last block
    # (exercises the no-pad path: OOB reads feed only columns that are clipped
    # on writeback).
    x2 = jax.random.normal(k_x2, (333, input_dim), dtype=jnp.float32)
    ref2 = reference(x2, w1, b1, w2, b2)
    out2 = jax.block_until_ready(neuro_layer(x2, w1, b1, w2, b2))
    assert out2.shape == (333, 1)
    assert jnp.allclose(out2, ref2, atol=1e-5, rtol=1e-5)

    print("KERNEL_OK")
</pallas_src>

<mosaic_0001>
module attributes {stable_mosaic.version = 11 : i64} {
  func.func @neuro_kernel(%arg0: i32, %arg1: i32, %arg2: memref<8x32xf32, #tpu.memory_space<vmem>>, %arg3: memref<32x32xf32, #tpu.memory_space<vmem>>, %arg4: memref<32x1xf32, #tpu.memory_space<vmem>>, %arg5: memref<32x1xf32, #tpu.memory_space<vmem>>, %arg6: memref<1x1xf32, #tpu.memory_space<smem>>, %arg7: memref<1x8xf32, #tpu.memory_space<vmem>>, %arg8: memref<32x8xf32, #tpu.memory_space<vmem>>) attributes {dimension_semantics = [#tpu.dimension_semantics<parallel>, #tpu.dimension_semantics<arbitrary>], iteration_bounds = array<i64: 1, 1>, scalar_prefetch = 0 : i64, scratch_operands = 1 : i64, tpu.core_type = #tpu.core_type<tc>, window_params = [{transform_indices = @transform_0, window_bounds = array<i64: 8, 32>}, {transform_indices = @transform_1, window_bounds = array<i64: 32, 32>}, {pipeline_mode = #tpu.pipeline_mode<synchronous>, transform_indices = @transform_2, window_bounds = array<i64: 32, 1>}, {pipeline_mode = #tpu.pipeline_mode<synchronous>, transform_indices = @transform_3, window_bounds = array<i64: 32, 1>}, {transform_indices = @transform_4, window_bounds = array<i64: 1, 1>}, {transform_indices = @transform_5, window_bounds = array<i64: 1, 8>}]} {
    %c0_i32 = arith.constant 0 : i32
    %0 = arith.cmpi eq, %arg1, %c0_i32 : i32
    %1 = arith.extui %0 : i1 to i32
    %c0_i32_0 = arith.constant 0 : i32
    %2 = arith.cmpi ne, %1, %c0_i32_0 : i32
    scf.if %2 {
      %cst_10 = arith.constant 0.000000e+00 : f32
      %12 = vector.broadcast %cst_10 : f32 to vector<32x8xf32>
      %c0_11 = arith.constant 0 : index
      %c0_12 = arith.constant 0 : index
      %13 = vector.load %arg8[%c0_11, %c0_12] : memref<32x8xf32, #tpu.memory_space<vmem>>, vector<32x8xf32>
      tpu.vector_store %arg8[%c0_11, %c0_12], %12 {strides = array<i32>} : memref<32x8xf32, #tpu.memory_space<vmem>>, vector<32x8xf32>,
    } else {
    }
    %c0 = arith.constant 0 : index
    %c0_1 = arith.constant 0 : index
    %3 = vector.load %arg2[%c0, %c0_1] : memref<8x32xf32, #tpu.memory_space<vmem>>, vector<8x32xf32>
    %c0_2 = arith.constant 0 : index
    %c0_3 = arith.constant 0 : index
    %4 = vector.load %arg8[%c0_2, %c0_3] : memref<32x8xf32, #tpu.memory_space<vmem>>, vector<32x8xf32>
    %c0_4 = arith.constant 0 : index
    %c0_5 = arith.constant 0 : index
    %5 = vector.load %arg3[%c0_4, %c0_5] : memref<32x32xf32, #tpu.memory_space<vmem>>, vector<32x32xf32>
    %cst = arith.constant dense<0.000000e+00> : vector<32x8xf32>
    %6 = tpu.matmul %5, %3, %cst {dimension_numbers = #tpu.dot_dimension_numbers<[1], [1], [0], [0], [0, 0, 1, 0], [], []>} : vector<32x32xf32>, vector<8x32xf32>, vector<32x8xf32> -> vector<32x8xf32>
    %7 = arith.addf %4, %6 : vector<32x8xf32>
    %c0_6 = arith.constant 0 : index
    %c0_7 = arith.constant 0 : index
    %8 = vector.load %arg8[%c0_6, %c0_7] : memref<32x8xf32, #tpu.memory_space<vmem>>, vector<32x8xf32>
    tpu.vector_store %arg8[%c0_6, %c0_7], %7 {strides = array<i32>} : memref<32x8xf32, #tpu.memory_space<vmem>>, vector<32x8xf32>,
    %c0_i32_8 = arith.constant 0 : i32
    %9 = arith.cmpi eq, %arg1, %c0_i32_8 : i32
    %10 = arith.extui %9 : i1 to i32
    %c0_i32_9 = arith.constant 0 : i32
    %11 = arith.cmpi ne, %10, %c0_i32_9 : i32
    scf.if %11 {
      %c0_10 = arith.constant 0 : index
      %c0_11 = arith.constant 0 : index
      %12 = vector.load %arg8[%c0_10, %c0_11] : memref<32x8xf32, #tpu.memory_space<vmem>>, vector<32x8xf32>
      %c0_12 = arith.constant 0 : index
      %c0_13 = arith.constant 0 : index
      %13 = vector.load %arg4[%c0_12, %c0_13] : memref<32x1xf32, #tpu.memory_space<vmem>>, vector<32x1xf32>
      %14 = vector.broadcast %13 : vector<32x1xf32> to vector<32x8xf32>
      %15 = arith.addf %12, %14 : vector<32x8xf32>
      %cst_14 = arith.constant 0.000000e+00 : f32
      %16 = vector.broadcast %cst_14 : f32 to vector<32x8xf32>
      %17 = arith.maximumf %15, %16 : vector<32x8xf32>
      %c0_15 = arith.constant 0 : index
      %c0_16 = arith.constant 0 : index
      %18 = vector.load %arg5[%c0_15, %c0_16] : memref<32x1xf32, #tpu.memory_space<vmem>>, vector<32x1xf32>
      %19 = vector.broadcast %18 : vector<32x1xf32> to vector<32x8xf32>
      %20 = arith.mulf %17, %19 : vector<32x8xf32>
      %cst_17 = arith.constant dense<0.000000e+00> : vector<8xf32>
      %21 = vector.multi_reduction <add>, %20, %cst_17 [0] : vector<32x8xf32> to vector<8xf32>
      %22 = vector.shape_cast %21 : vector<8xf32> to vector<1x8xf32>
      %c0_18 = arith.constant 0 : index
      %c0_19 = arith.constant 0 : index
      %23 = memref.load %arg6[%c0_18, %c0_19] : memref<1x1xf32, #tpu.memory_space<smem>>
      %24 = vector.broadcast %23 : f32 to vector<1x8xf32>
      %25 = arith.addf %22, %24 : vector<1x8xf32>
      %c0_20 = arith.constant 0 : index
      %c0_21 = arith.constant 0 : index
      %26 = vector.load %arg7[%c0_20, %c0_21] : memref<1x8xf32, #tpu.memory_space<vmem>>, vector<1x8xf32>
      tpu.vector_store %arg7[%c0_20, %c0_21], %25 {strides = array<i32>} : memref<1x8xf32, #tpu.memory_space<vmem>>, vector<1x8xf32>,
    } else {
    }
    return
  }
  func.func @transform_0(%arg0: i32, %arg1: i32) -> (i32, i32) {
    %c0_i32 = arith.constant 0 : i32
    return %arg0, %arg1 : i32, i32
  }
  func.func @transform_1(%arg0: i32, %arg1: i32) -> (i32, i32) {
    %c0_i32 = arith.constant 0 : i32
    %c0_i32_0 = arith.constant 0 : i32
    return %c0_i32, %arg1 : i32, i32
  }
  func.func @transform_2(%arg0: i32, %arg1: i32) -> (i32, i32) {
    %c0_i32 = arith.constant 0 : i32
    %c0_i32_0 = arith.constant 0 : i32
    %c0_i32_1 = arith.constant 0 : i32
    return %c0_i32, %c0_i32_0 : i32, i32
  }
  func.func @transform_3(%arg0: i32, %arg1: i32) -> (i32, i32) {
    %c0_i32 = arith.constant 0 : i32
    %c0_i32_0 = arith.constant 0 : i32
    %c0_i32_1 = arith.constant 0 : i32
    return %c0_i32, %c0_i32_0 : i32, i32
  }
  func.func @transform_4(%arg0: i32, %arg1: i32) -> (i32, i32) {
    %c0_i32 = arith.constant 0 : i32
    %c0_i32_0 = arith.constant 0 : i32
    %c0_i32_1 = arith.constant 0 : i32
    return %c0_i32, %c0_i32_0 : i32, i32
  }
  func.func @transform_5(%arg0: i32, %arg1: i32) -> (i32, i32) {
    %c0_i32 = arith.constant 0 : i32
    %c0_i32_0 = arith.constant 0 : i32
    return %c0_i32, %arg0 : i32, i32
  }
}

</mosaic_0001>

<bundles_post_ra>
// kernel: neuro_layer.1
= control target key start
LH: loop header
LB: loop body
LE: loop exit
PB: predicated region body
PF: predicated region fallthrough
CT: control target
= control target key end

     0   :  { %vm40_vm0 = vcmask 261120   ;;  %v298_v7 = vmov 0   ;;  %s405_s0 = inlined_call_operand.vmem [shape: f32[8,32], index: 0, kind: input, shape index: {}]   ;;  %s406_s1 = inlined_call_operand.vmem [shape: f32[32,32], index: 1, kind: input, shape index: {}]   ;;  %s407_s2 = inlined_call_operand.vmem [shape: f32[32,1], index: 2, kind: input, shape index: {}]   ;;  %s408_s3 = inlined_call_operand.vmem [shape: f32[32,1], index: 3, kind: input, shape index: {}]   ;;  %s409_s4 = inlined_call_operand.<no memory space> [shape: f32[1,1], index: 4, kind: input, shape index: {}]   ;;  %s410_s5 = inlined_call_operand.hbm [shape: f32[1,8], index: 5, kind: output, shape index: {}]  }
   0x1   :  { %v31_v0 = vld [vmem:[%s405_s0] sm:$0xff]  ;;  %v38_v2 = vld [vmem:[%s406_s1 + $0x10] sm:$0xff]  ;;  %v37_v3 = vld [vmem:[%s406_s1 + $0x8] sm:$0xff]  ;;  %272 = vset.pattern.permute.xlu0 %v298_v7  ;;  %273 = vset.pattern.permute.xlu1 %v298_v7 }
   0x2   :  { %v36_v1 = vld [vmem:[%s406_s1] sm:$0xff]  ;;  %259 = vmatprep.subr.msk.mxu0 %vm40_vm0, %v31_v0  ;;  %267 = vmatprep.subr.msk.mxu1 %vm40_vm0, %v31_v0  ;;  %v39_v4 = vld [vmem:[%s406_s1 + $0x18] sm:$0xff]  ;;  %v159_v6 = vld [vmem:[%s407_s2 + $0x10] sm:$0xff] }
   0x3   :  { %260 = vmatpush3.xpose.msk.msra.mxu0 %vm40_vm0, %v31_v0  ;;  %268 = vmatpush3.xpose.msk.msra.mxu1 %vm40_vm0, %v31_v0  ;;  %v157_v5 = vld [vmem:[%s407_s2] sm:$0xff] }
   0x4   :  { %261 = vmatprep.mubr.msk.f32.mxu0 %vm40_vm0, %v36_v1  ;;  %264 = vmatprep.mubr.msk.f32.mxu1 %vm40_vm0, %v38_v2 }
   0x5   :  { %11 = vsyncpa [#allocation5], 0  ;;  %163 = vperm.xlu0 %272, %v157_v5   ;;  %173 = vperm.xlu1 %273, %v159_v6   ;;  %v158_v8 = vld [vmem:[%s407_s2 + $0x8] sm:$0xff]  ;;  %v160_v9 = vld [vmem:[%s407_s2 + $0x18] sm:$0xff]  ;;  %vm26_vm1 = vcmask 64512   ;;  %v299_v10 = vmov 0.0   ;;  %v231_v63 = vstv %s409_s4 }
   0x6   :  { %262 = vmatmul.mubr.msk.f32.vlgmr.msra.gmra.mrb[0].mxu0 %vm40_vm0, %v37_v3  ;;  %265 = vmatmul.mubr.msk.f32.vlgmr.msra.gmra.mrb[0].mxu1 %vm40_vm0, %v39_v4  ;;  %28 = vst.msk [vmem:[#allocation2 + $0x8] sm:$0xff] %vm26_vm1, %v299_v10  ;;  %27 = vst.msk [vmem:[#allocation2] sm:$0xff] %vm26_vm1, %v299_v10  ;;  %v189_v11 = vld [vmem:[%s408_s3] sm:$0xff]  ;;  %v190_v12 = vld [vmem:[%s408_s3 + $0x8] sm:$0xff]  ;;  %s300_s17 = smov [#allocation4]   ;;  %vm233_vm2 = vcmask 57344  }
   0x7   :  { %29 = vst.msk [vmem:[#allocation2 + $0x10] sm:$0xff] %vm26_vm1, %v299_v10  ;;  %30 = vst.msk [vmem:[#allocation2 + $0x18] sm:$0xff] %vm26_vm1, %v299_v10  ;;  %v191_v13 = vld [vmem:[%s408_s3 + $0x10] sm:$0xff]  ;;  %v192_v14 = vld [vmem:[%s408_s3 + $0x18] sm:$0xff]  ;;  %s241_s18 = sshll.u32 %s300_s17, 4  ;;  %s242_s18 = int_to_ptr.vmem [resolvable:$true] %s241_s18 }
   0x8   :  { %s274_s19 = scalar_lea.vmem %s242_s18, 16  ;;  %s278_s20 = scalar_lea.vmem %s242_s18, 32 }
   0x9   :  { %168 = vperm.xlu0 %272, %v158_v8   ;;  %178 = vperm.xlu1 %273, %v160_v9   ;;  %p275_p0 = scmp.ne.s32.totalorder %s242_s18, %s274_s19  ;;  %p279_p1 = scmp.lt.s32.totalorder %s242_s18, %s242_s18 }
   0xa   :  { %p280_p2 = scmp.lt.s32.totalorder %s278_s20, %s274_s19 }
   0xc   :  { %p281_p3 = por %p280_p2, %p279_p1 }
   0xd   :  { %195 = vperm.xlu0 %272, %v189_v11   ;;  %200 = vperm.xlu1 %273, %v190_v12   ;;  %v33_v16 = vld [vmem:[#allocation2 + $0x8] sm:$0xff]  ;;  %v32_v19 = vld [vmem:[#allocation2] sm:$0xff] }
   0xe   :  { %v35_v17 = vld [vmem:[#allocation2 + $0x18] sm:$0xff]  ;;  %v34_v20 = vld [vmem:[#allocation2 + $0x10] sm:$0xff]  ;;  %p282_p4 = pnand %p281_p3, %p275_p0 }
  0x11   :  { %205 = vperm.xlu0 %272, %v191_v13   ;;  %210 = vperm.xlu1 %273, %v192_v14  }
  0x84   :  { %v164_v15 = vpop.permute.xlu0 %163  ;;  %v174_v18 = vpop.permute.xlu1 %173 }
  0x88   :  { %v169_v29 = vpop.permute.xlu0 %168  ;;  %v179_v30 = vpop.permute.xlu1 %178 }
  0x8c   :  { %v196_v31 = vpop.permute.xlu0 %195  ;;  %v201_v34 = vpop.permute.xlu1 %200 }
  0x90   :  { %v206_v46 = vpop.permute.xlu0 %205  ;;  %v211_v50 = vpop.permute.xlu1 %210 }
  0xd9   :  { %v263_v21 = vpop.f32.mrb[0].mxu0  ;;  %v266_v22 = vpop.f32.mrb[0].mxu1 }
  0xda   :  { %v142_v23 = vadd.f32 %v263_v21, %v33_v16  ;;  %v144_v24 = vadd.f32 %v266_v22, %v35_v17  ;;  %v122_v25 = vpop.f32.mrb[1].mxu0  ;;  %v132_v26 = vpop.f32.mrb[1].mxu1 }
  0xdb   :  { %v141_v27 = vadd.f32 %v122_v25, %v32_v19  ;;  %v143_v28 = vadd.f32 %v132_v26, %v34_v20 }
  0xdc   :  { %147 = vst.msk [vmem:[#allocation2 + $0x8] sm:$0xff] %vm26_vm1, %v142_v23  ;;  %149 = vst.msk [vmem:[#allocation2 + $0x18] sm:$0xff] %vm26_vm1, %v144_v24 }
  0xdd   :  { %146 = vst.msk [vmem:[#allocation2] sm:$0xff] %vm26_vm1, %v141_v27  ;;  %148 = vst.msk [vmem:[#allocation2 + $0x10] sm:$0xff] %vm26_vm1, %v143_v28 }
  0xe3   :  { %v154_v32 = vld [vmem:[#allocation2 + $0x8] sm:$0xff]  ;;  %v156_v33 = vld [vmem:[#allocation2 + $0x18] sm:$0xff] }
  0xe4   :  { %v153_v35 = vld [vmem:[#allocation2] sm:$0xff]  ;;  %v182_v36 = vadd.f32 %v169_v29, %v154_v32  ;;  %v155_v37 = vld [vmem:[#allocation2 + $0x10] sm:$0xff]  ;;  %v184_v38 = vadd.f32 %v179_v30, %v156_v33 }
  0xe5   :  { %v181_v39 = vadd.f32 %v164_v15, %v153_v35  ;;  %v183_v40 = vadd.f32 %v174_v18, %v155_v37 }
  0xe6   :  { %v186_v41 = vmax.f32 %v182_v36, 0.0  ;;  %v188_v44 = vmax.f32 %v184_v38, 0.0 }
  0xe7   :  { %v185_v42 = vmax.f32 %v181_v39, 0.0  ;;  %v187_v43 = vmax.f32 %v183_v40, 0.0 }
  0xe8   :  { %v214_v45 = vmul.f32 %v201_v34, %v186_v41  ;;  %v216_v52 = vmul.f32 %v211_v50, %v188_v44 }
  0xe9   :  { %v213_v47 = vmul.f32 %v196_v31, %v185_v42  ;;  %v215_v48 = vmul.f32 %v206_v46, %v187_v43 }
  0xea   :  { %v218_v49 = vsel %vm26_vm1, %v214_v45, 0.0  ;;  %v222_v56 = vsel %vm26_vm1, %v216_v52, 0.0 }
  0xeb   :  { %v217_v51 = vsel %vm26_vm1, %v213_v47, 0.0  ;;  %v220_v54 = vsel %vm26_vm1, %v215_v48, 0.0 }
  0xec   :  { %v219_v53 = vadd.f32 %v218_v49, %v217_v51 }
  0xee   :  { %v221_v55 = vadd.f32 %v220_v54, %v219_v53 }
  0xf0   :  { %v223_v57 = vadd.f32 %v222_v56, %v221_v55 }
  0xf2   :  { %v224_v58 = vrot.slane %v223_v57, 4 }
  0xf4   :  { %v225_v59 = vadd.f32 %v224_v58, %v223_v57 }
  0xf6   :  { %v226_v60 = vrot.slane %v225_v59, 2 }
  0xf8   :  { %v227_v61 = vadd.f32 %v226_v60, %v225_v59 }
  0xfa   :  { %v228_v62 = vrot.slane %v227_v61, 1 }
  0xfc   :  { %v229_v0 = vadd.f32 %v228_v62, %v227_v61 }
  0xfe   :  { %v232_v1 = vadd.f32 %v231_v63, %v229_v0 }
 0x100   :  { %234 = vst.msk [vmem:[#allocation4] sm:$0x1] %vm233_vm2, %v232_v1 }
 0x101   :  { %285 = shalt.err (!%p282_p4)
}
 0x102   :  { %s286_s23 = scalar_lea.hbm %s410_s5, 16 }
 0x103   :  { %p287_p5 = scmp.ne.s32.totalorder %s410_s5, %s286_s23  ;;  %p290_p6 = scmp.lt.u32.totalorder %s286_s23, %s410_s5 }
 0x105   :  { %p292_p7 = pnand %p290_p6, %p287_p5 }
 0x107   :  { %295 = shalt.err (!%p292_p7)
}
 0x108   :  { %244 = dma.vmem_to_hbm [thread:$0]  %s242_s18, 16, %s410_s5, [#allocation5]  }
 0x109   :  { %296 = dma.done.wait [#allocation5], 16  }
 0x10a   :  { %297 = vsyncadd [#allocation5], 4294967280 }
 0x10b   :  { %248 = vsyncpa [#allocation5], 1 }

</bundles_post_ra>
